<compile_context>
chip_gen: v5e
topology: v5e:2x2
jax: 0.10.0
libtpu: 0.0.40
codegen_flags: <defaults>
</compile_context>

<pallas_src>
import jax
import jax.numpy as jnp
from jax.experimental import pallas as pl
from jax.experimental.pallas import tpu as pltpu

_LANE = 128
_SUBLANE = 8


def _sigmoid(z):
    # Single EUP push per sigmoid, exact: sigmoid(z) = 0.5*tanh(0.5*z) + 0.5.
    return 0.5 * jnp.tanh(0.5 * z) + 0.5


def network5_kernel(params_ref, x0_ref, x1_ref, o_ref):
    # params_ref: SMEM f32[9] = [w1_00, w1_01, w1_10, w1_11, b1_0, b1_1,
    #                            w2_00, w2_01, b2_0]   (PyTorch row-major)
    # x0_ref/x1_ref: VMEM f32[tile_rows, 128] — feature 0 / feature 1 planes.
    # o_ref:         VMEM f32[tile_rows, 128] — fully dense, unmasked stores.
    x0 = x0_ref[...]
    x1 = x1_ref[...]

    w00 = params_ref[0]
    w01 = params_ref[1]
    w10 = params_ref[2]
    w11 = params_ref[3]
    b0 = params_ref[4]
    b1 = params_ref[5]
    v0 = params_ref[6]
    v1 = params_ref[7]
    c = params_ref[8]

    # fc1 + sigmoid (h = sigmoid(x @ W1.T + b1)) as scalar-weight VPU FMAs.
    h0 = _sigmoid(w00 * x0 + w01 * x1 + b0)
    h1 = _sigmoid(w10 * x0 + w11 * x1 + b1)
    # fc2 + sigmoid (y = sigmoid(h @ W2.T + b2)).
    y = _sigmoid(v0 * h0 + v1 * h1 + c)

    o_ref[...] = y.astype(o_ref.dtype)


def network5_forward(x, w1, b1, w2, b2, *, max_block_rows=4096, min_grid_steps=4):
    """x: (B, 2) f32.  w1: (2, 2), b1: (2,), w2: (1, 2), b2: (1,)
    (PyTorch nn.Linear parameter shapes).  Returns (B, 1) f32."""
    B = x.shape[0]

    # ---- tile sizing: (tile_rows, 128) f32 blocks, tile_rows multiple of 8 ----
    rows = pl.cdiv(B, _LANE)                        # 128 samples per row
    tile_rows = min(max_block_rows, pl.cdiv(rows, min_grid_steps))
    tile_rows = max(_SUBLANE, pl.cdiv(tile_rows, _SUBLANE) * _SUBLANE)
    rows_pad = pl.cdiv(rows, tile_rows) * tile_rows
    b_pad = rows_pad * _LANE
    grid_steps = rows_pad // tile_rows

    # ---- one fused HBM pass: pad + deinterleave into dense feature planes ----
    x = jnp.asarray(x, jnp.float32)
    xp = jnp.pad(x, ((0, b_pad - B), (0, 0)))       # (b_pad, 2), zero tail
    x0 = xp[:, 0].reshape(rows_pad, _LANE)          # (rows_pad, 128)
    x1 = xp[:, 1].reshape(rows_pad, _LANE)

    # All 9 parameters packed into one SMEM scalar array.
    params = jnp.concatenate([
        jnp.asarray(w1, jnp.float32).reshape(-1),   # w00, w01, w10, w11
        jnp.asarray(b1, jnp.float32).reshape(-1),   # b0, b1
        jnp.asarray(w2, jnp.float32).reshape(-1),   # v0, v1
        jnp.asarray(b2, jnp.float32).reshape(-1),   # c
    ])                                              # (9,)

    cost = pl.CostEstimate(
        flops=12 * b_pad,            # 6 FMAs per sample
        transcendentals=3 * b_pad,   # 3 tanh per sample
        bytes_accessed=12 * b_pad,   # 8 B in + 4 B out per sample
    )

    out = pl.pallas_call(
        network5_kernel,
        out_shape=jax.ShapeDtypeStruct((rows_pad, _LANE), jnp.float32),
        grid=(grid_steps,),
        in_specs=[
            pl.BlockSpec(memory_space=pltpu.MemorySpace.SMEM),   # params (whole array)
            pl.BlockSpec((tile_rows, _LANE), lambda i: (i, 0)),  # x0 tile
            pl.BlockSpec((tile_rows, _LANE), lambda i: (i, 0)),  # x1 tile
        ],
        out_specs=pl.BlockSpec((tile_rows, _LANE), lambda i: (i, 0)),
        compiler_params=pltpu.CompilerParams(
            dimension_semantics=("parallel",),      # batch tiles independent (v7x 2 TCs)
            vmem_limit_bytes=32 * 1024 * 1024,      # actual use <= ~12 MiB; safe on v7x
        ),
        cost_estimate=cost,
    )(params, x0, x1)

    # (rows_pad, 128) -> (b_pad,) is a free row-major reshape; drop the pad.
    return out.reshape(b_pad)[:B].reshape(B, 1)


def _init_params(key):
    """Deterministic init mirroring PyTorch nn.Linear default:
    U(-1/sqrt(fan_in), 1/sqrt(fan_in)) for weights and biases."""
    k1, k2, k3, k4 = jax.random.split(key, 4)
    bound = 1.0 / jnp.sqrt(2.0)   # fan_in = 2 for both layers
    w1 = jax.random.uniform(k1, (2, 2), jnp.float32, -bound, bound)
    b1 = jax.random.uniform(k2, (2,), jnp.float32, -bound, bound)
    w2 = jax.random.uniform(k3, (1, 2), jnp.float32, -bound, bound)
    b2 = jax.random.uniform(k4, (1,), jnp.float32, -bound, bound)
    return w1, b1, w2, b2


def _reference(x, w1, b1, w2, b2):
    h = jax.nn.sigmoid(x @ w1.T + b1)
    return jax.nn.sigmoid(h @ w2.T + b2)


if __name__ == "__main__":
    key = jax.random.PRNGKey(0)
    kx, kx2, kp = jax.random.split(key, 3)

    w1, b1, w2, b2 = _init_params(kp)

    # Small-shape check (single tile, heavy padding path).
    B = 8
    x = jax.random.normal(kx, (B, 2), jnp.float32)
    out = jax.block_until_ready(network5_forward(x, w1, b1, w2, b2))
    assert out.shape == (B, 1)
    assert jnp.allclose(out, _reference(x, w1, b1, w2, b2), atol=1e-5), \
        "mismatch vs reference (small batch)"

    # Larger batch exercises the multi-step grid + ragged-tail padding path.
    B2 = 3000
    x2 = jax.random.normal(kx2, (B2, 2), jnp.float32)
    out2 = jax.block_until_ready(network5_forward(x2, w1, b1, w2, b2))
    assert out2.shape == (B2, 1)
    assert jnp.allclose(out2, _reference(x2, w1, b1, w2, b2), atol=1e-5), \
        "mismatch vs reference (tiled batch)"

    print("KERNEL_OK")
</pallas_src>

<mosaic_0001>
module attributes {stable_mosaic.version = 11 : i64} {
  func.func @network5_kernel(%arg0: i32, %arg1: memref<9xf32, #tpu.memory_space<smem>>, %arg2: memref<8x128xf32, #tpu.memory_space<vmem>>, %arg3: memref<8x128xf32, #tpu.memory_space<vmem>>, %arg4: memref<8x128xf32, #tpu.memory_space<vmem>>) attributes {dimension_semantics = [#tpu.dimension_semantics<parallel>], iteration_bounds = array<i64: 1>, scalar_prefetch = 0 : i64, scratch_operands = 0 : i64, tpu.core_type = #tpu.core_type<tc>, window_params = [{transform_indices = @transform_0, window_bounds = array<i64: 9>}, {transform_indices = @transform_1, window_bounds = array<i64: 8, 128>}, {transform_indices = @transform_2, window_bounds = array<i64: 8, 128>}, {transform_indices = @transform_3, window_bounds = array<i64: 8, 128>}]} {
    %c0 = arith.constant 0 : index
    %c0_0 = arith.constant 0 : index
    %0 = vector.load %arg2[%c0, %c0_0] : memref<8x128xf32, #tpu.memory_space<vmem>>, vector<8x128xf32>
    %c0_1 = arith.constant 0 : index
    %c0_2 = arith.constant 0 : index
    %1 = vector.load %arg3[%c0_1, %c0_2] : memref<8x128xf32, #tpu.memory_space<vmem>>, vector<8x128xf32>
    %c0_3 = arith.constant 0 : index
    %2 = memref.load %arg1[%c0_3] : memref<9xf32, #tpu.memory_space<smem>>
    %c1 = arith.constant 1 : index
    %3 = memref.load %arg1[%c1] : memref<9xf32, #tpu.memory_space<smem>>
    %c2 = arith.constant 2 : index
    %4 = memref.load %arg1[%c2] : memref<9xf32, #tpu.memory_space<smem>>
    %c3 = arith.constant 3 : index
    %5 = memref.load %arg1[%c3] : memref<9xf32, #tpu.memory_space<smem>>
    %c4 = arith.constant 4 : index
    %6 = memref.load %arg1[%c4] : memref<9xf32, #tpu.memory_space<smem>>
    %c5 = arith.constant 5 : index
    %7 = memref.load %arg1[%c5] : memref<9xf32, #tpu.memory_space<smem>>
    %c6 = arith.constant 6 : index
    %8 = memref.load %arg1[%c6] : memref<9xf32, #tpu.memory_space<smem>>
    %c7 = arith.constant 7 : index
    %9 = memref.load %arg1[%c7] : memref<9xf32, #tpu.memory_space<smem>>
    %c8 = arith.constant 8 : index
    %10 = memref.load %arg1[%c8] : memref<9xf32, #tpu.memory_space<smem>>
    %11 = vector.broadcast %2 : f32 to vector<8x128xf32>
    %12 = arith.mulf %11, %0 : vector<8x128xf32>
    %13 = vector.broadcast %3 : f32 to vector<8x128xf32>
    %14 = arith.mulf %13, %1 : vector<8x128xf32>
    %15 = arith.addf %12, %14 : vector<8x128xf32>
    %16 = vector.broadcast %6 : f32 to vector<8x128xf32>
    %17 = arith.addf %15, %16 : vector<8x128xf32>
    %cst = arith.constant 5.000000e-01 : f32
    %18 = vector.broadcast %cst : f32 to vector<8x128xf32>
    %19 = arith.mulf %18, %17 : vector<8x128xf32>
    %20 = math.tanh %19 : vector<8x128xf32>
    %cst_4 = arith.constant 5.000000e-01 : f32
    %21 = vector.broadcast %cst_4 : f32 to vector<8x128xf32>
    %22 = arith.mulf %21, %20 : vector<8x128xf32>
    %cst_5 = arith.constant 5.000000e-01 : f32
    %23 = vector.broadcast %cst_5 : f32 to vector<8x128xf32>
    %24 = arith.addf %22, %23 : vector<8x128xf32>
    %25 = vector.broadcast %4 : f32 to vector<8x128xf32>
    %26 = arith.mulf %25, %0 : vector<8x128xf32>
    %27 = vector.broadcast %5 : f32 to vector<8x128xf32>
    %28 = arith.mulf %27, %1 : vector<8x128xf32>
    %29 = arith.addf %26, %28 : vector<8x128xf32>
    %30 = vector.broadcast %7 : f32 to vector<8x128xf32>
    %31 = arith.addf %29, %30 : vector<8x128xf32>
    %cst_6 = arith.constant 5.000000e-01 : f32
    %32 = vector.broadcast %cst_6 : f32 to vector<8x128xf32>
    %33 = arith.mulf %32, %31 : vector<8x128xf32>
    %34 = math.tanh %33 : vector<8x128xf32>
    %cst_7 = arith.constant 5.000000e-01 : f32
    %35 = vector.broadcast %cst_7 : f32 to vector<8x128xf32>
    %36 = arith.mulf %35, %34 : vector<8x128xf32>
    %cst_8 = arith.constant 5.000000e-01 : f32
    %37 = vector.broadcast %cst_8 : f32 to vector<8x128xf32>
    %38 = arith.addf %36, %37 : vector<8x128xf32>
    %39 = vector.broadcast %8 : f32 to vector<8x128xf32>
    %40 = arith.mulf %39, %24 : vector<8x128xf32>
    %41 = vector.broadcast %9 : f32 to vector<8x128xf32>
    %42 = arith.mulf %41, %38 : vector<8x128xf32>
    %43 = arith.addf %40, %42 : vector<8x128xf32>
    %44 = vector.broadcast %10 : f32 to vector<8x128xf32>
    %45 = arith.addf %43, %44 : vector<8x128xf32>
    %cst_9 = arith.constant 5.000000e-01 : f32
    %46 = vector.broadcast %cst_9 : f32 to vector<8x128xf32>
    %47 = arith.mulf %46, %45 : vector<8x128xf32>
    %48 = math.tanh %47 : vector<8x128xf32>
    %cst_10 = arith.constant 5.000000e-01 : f32
    %49 = vector.broadcast %cst_10 : f32 to vector<8x128xf32>
    %50 = arith.mulf %49, %48 : vector<8x128xf32>
    %cst_11 = arith.constant 5.000000e-01 : f32
    %51 = vector.broadcast %cst_11 : f32 to vector<8x128xf32>
    %52 = arith.addf %50, %51 : vector<8x128xf32>
    %c0_12 = arith.constant 0 : index
    %c0_13 = arith.constant 0 : index
    %53 = vector.load %arg4[%c0_12, %c0_13] : memref<8x128xf32, #tpu.memory_space<vmem>>, vector<8x128xf32>
    tpu.vector_store %arg4[%c0_12, %c0_13], %52 {strides = array<i32>} : memref<8x128xf32, #tpu.memory_space<vmem>>, vector<8x128xf32>,
    return
  }
  func.func @transform_0(%arg0: i32) -> i32 {
    %c0_i32 = arith.constant 0 : i32
    %c0_i32_0 = arith.constant 0 : i32
    return %c0_i32 : i32
  }
  func.func @transform_1(%arg0: i32) -> (i32, i32) {
    %c0_i32 = arith.constant 0 : i32
    %c0_i32_0 = arith.constant 0 : i32
    return %arg0, %c0_i32 : i32, i32
  }
  func.func @transform_2(%arg0: i32) -> (i32, i32) {
    %c0_i32 = arith.constant 0 : i32
    %c0_i32_0 = arith.constant 0 : i32
    return %arg0, %c0_i32 : i32, i32
  }
  func.func @transform_3(%arg0: i32) -> (i32, i32) {
    %c0_i32 = arith.constant 0 : i32
    %c0_i32_0 = arith.constant 0 : i32
    return %arg0, %c0_i32 : i32, i32
  }
}

</mosaic_0001>

<bundles_post_ra>
// kernel: tpu_custom_call.1
= control target key start
LH: loop header
LB: loop body
LE: loop exit
PB: predicated region body
PF: predicated region fallthrough
CT: control target
= control target key end

     0   :  { %8 = vsyncpa [#allocation5], 0  ;;  %s266_s0 = inlined_call_operand.hbm [shape: f32[9], index: 0, kind: input, shape index: {}]   ;;  %s267_s1 = inlined_call_operand.hbm [shape: f32[8,128], index: 1, kind: input, shape index: {}]   ;;  %s268_s2 = inlined_call_operand.hbm [shape: f32[8,128], index: 2, kind: input, shape index: {}]   ;;  %s269_s3 = inlined_call_operand.hbm [shape: f32[8,128], index: 3, kind: output, shape index: {}]  }
   0x1   :  { %9 = vsyncpa [#allocation3], 0 }
   0x2   :  { %10 = vsyncpa [#allocation8], 0 }
   0x3   :  { %11 = vsyncpa [#allocation4], 0  ;;  %s17_s14 = sshll.u32 %s266_s0, 4  ;;  %s26_s17 = sshll.u32 %s267_s1, 4  ;;  %s18_s14 = int_to_ptr.hbm [resolvable:$true] %s17_s14  ;;  %s27_s17 = int_to_ptr.hbm [resolvable:$true] %s26_s17 }
   0x4   :  { %s230_s18 = smov [#allocation2]   ;;  %s231_s19 = smov [#allocation6]  }
   0x5   :  { %20 = dma.hbm_to_smem %s18_s14, 16, %s230_s18, [#allocation5]  }
   0x6   :  { %s28_s20 = sshll.u32 %s231_s19, 4  ;;  %s37_s23 = sshll.u32 %s268_s2, 4  ;;  %s29_s20 = int_to_ptr.vmem [resolvable:$true] %s28_s20  ;;  %s38_s23 = int_to_ptr.hbm [resolvable:$true] %s37_s23 }
   0x7   :  { %31 = dma.hbm_to_vmem [thread:$0]  %s27_s17, 128, %s29_s20, [#allocation3]  }
   0x8   :  { %s232_s24 = smov [#allocation7]  }
   0x9   :  { %s39_s25 = sshll.u32 %s232_s24, 4  ;;  %s40_s25 = int_to_ptr.vmem [resolvable:$true] %s39_s25 }
   0xa   :  { %42 = dma.hbm_to_vmem [thread:$0]  %s38_s23, 128, %s40_s25, [#allocation8]  }
   0xb   :  { %222 = dma.done.wait [#allocation5], 16  }
   0xc   :  { %223 = vsyncadd [#allocation5], 4294967280 }
   0xd   :  { %224 = dma.done.wait [#allocation3], 128  }
   0xe   :  { %225 = vsyncadd [#allocation3], 4294967168 }
   0xf   :  { %226 = dma.done.wait [#allocation8], 128  }
  0x10   :  { %227 = vsyncadd [#allocation8], 4294967168 }
  0x11   :  { %55 = sfence }
  0x12   :  { %s58_s0 = sld [smem:[#allocation2]]  ;;  %v56_v0 = vld [vmem:[#allocation6] sm:$0xff]  ;;  %v57_v1 = vld [vmem:[#allocation7] sm:$0xff]  ;;  %s233_s5 = smov [#allocation9]  }
  0x13   :  { %s120_s1 = sld [smem:[#allocation2 + $0x1]]  ;;  %s106_s6 = sshll.u32 %s233_s5, 4  ;;  %s107_s6 = int_to_ptr.vmem [resolvable:$true] %s106_s6 }
  0x14   :  { %s121_s26 = sld [smem:[#allocation2 + $0x2]]  ;;  %s108_s9 = sshll.u32 %s269_s3, 4  ;;  %s109_s9 = int_to_ptr.hbm [resolvable:$true] %s108_s9 }
  0x15   :  { %s122_s27 = sld [smem:[#allocation2 + $0x3]] }
  0x16   :  { %s123_s2 = sld [smem:[#allocation2 + $0x4]] }
  0x17   :  { %s124_s28 = sld [smem:[#allocation2 + $0x5]] }
  0x18   :  { %v67_v2 = vstv %s58_s0  ;;  %s125_s29 = sld [smem:[#allocation2 + $0x6]] }
  0x19   :  { %v68_v3 = vmul.f32 %v67_v2, %v56_v0  ;;  %v69_v4 = vstv %s120_s1  ;;  %s126_s30 = sld [smem:[#allocation2 + $0x7]] }
  0x1a   :  { %v70_v5 = vmul.f32 %v69_v4, %v57_v1  ;;  %v78_v6 = vstv %s121_s26  ;;  %s127_s4 = sld [smem:[#allocation2 + $0x8]] }
  0x1b   :  { %v79_v7 = vmul.f32 %v78_v6, %v56_v0  ;;  %v80_v8 = vstv %s122_s27 }
  0x1c   :  { %v71_v9 = vadd.f32 %v70_v5, %v68_v3  ;;  %v72_v10 = vstv %s123_s2  ;;  %v81_v11 = vmul.f32 %v80_v8, %v57_v1 }
  0x1d   :  { %v83_v12 = vstv %s124_s28 }
  0x1e   :  { %v73_v13 = vadd.f32 %v72_v10, %v71_v9  ;;  %v82_v14 = vadd.f32 %v81_v11, %v79_v7  ;;  %v89_v21 = vstv %s125_s29 }
  0x1f   :  { %v91_v24 = vstv %s126_s30 }
  0x20   :  { %v74_v15 = vmul.f32 0.5, %v73_v13  ;;  %v84_v16 = vadd.f32 %v83_v12, %v82_v14  ;;  %v94_v28 = vstv %s127_s4 }
  0x22   :  { %132 = vtanh.f32 %v74_v15  ;;  %v85_v17 = vmul.f32 0.5, %v84_v16 }
  0x24   :  { %134 = vtanh.f32 %v85_v17 }
  0x28   :  { %v133_v18 = vpop.eup %132 }
  0x29   :  { %v76_v19 = vmul.f32 0.5, %v133_v18 }
  0x2a   :  { %v135_v20 = vpop.eup %134 }
  0x2b   :  { %v77_v22 = vadd.f32 0.5, %v76_v19  ;;  %v87_v23 = vmul.f32 0.5, %v135_v20 }
  0x2d   :  { %v88_v25 = vadd.f32 0.5, %v87_v23  ;;  %v90_v26 = vmul.f32 %v89_v21, %v77_v22 }
  0x2f   :  { %v92_v27 = vmul.f32 %v91_v24, %v88_v25 }
  0x31   :  { %v93_v29 = vadd.f32 %v92_v27, %v90_v26 }
  0x33   :  { %v95_v30 = vadd.f32 %v94_v28, %v93_v29 }
  0x35   :  { %v96_v31 = vmul.f32 0.5, %v95_v30 }
  0x37   :  { %136 = vtanh.f32 %v96_v31 }
  0x3d   :  { %v137_v32 = vpop.eup %136 }
  0x3e   :  { %v98_v33 = vmul.f32 0.5, %v137_v32 }
  0x40   :  { %v99_v34 = vadd.f32 0.5, %v98_v33 }
  0x42   :  { %100 = vst [vmem:[#allocation9] sm:$0xff] %v99_v34 }
  0x43   :  { %111 = dma.vmem_to_hbm [thread:$0]  %s107_s6, 128, %s109_s9, [#allocation4]  }
  0x44   :  { %228 = dma.done.wait [#allocation4], 128  }
  0x45   :  { %229 = vsyncadd [#allocation4], 4294967168 }
  0x46   :  { %116 = vsyncpa [#allocation3], 1 }
  0x47   :  { %117 = vsyncpa [#allocation8], 1 }
  0x48   :  { %118 = vsyncpa [#allocation4], 1 }
  0x49   :  { %119 = vsyncpa [#allocation5], 1 }

</bundles_post_ra>
